<compile_context>
chip_gen: v5e
topology: v5e:2x2
jax: 0.10.0
libtpu: 0.0.40
codegen_flags: <defaults>
</compile_context>

<pallas_src>
import functools

import jax
import jax.numpy as jnp
from jax.experimental import pallas as pl
from jax.experimental.pallas import tpu as pltpu


def _activation(x, kind):
    if kind == "relu":
        return jnp.maximum(x, 0.0)
    if kind == "elu":
        # Clamp before exp so the discarded branch never overflows to inf.
        return jnp.where(x > 0, x, jnp.exp(jnp.minimum(x, 0.0)) - 1.0)
    if kind == "leakyrelu":
        # Module uses nn.LeakyReLU(0.2) explicitly.
        return jnp.where(x > 0, x, 0.2 * x)
    raise ValueError(f"unknown activation: {kind}")


def _mlp_kernel(x_ref, w_in_ref, b_in_ref, w_hid_ref, b_hid_ref,
                w_out_ref, b_out_ref, o_ref, *, n_hidden_layers, activation):
    # x_ref:    [D_in, TILE_B]   (batch on lanes)
    # w_in_ref: [H, D_in], b_in_ref: [H, 1]
    # w_hid_ref:[L, H, H], b_hid_ref:[L, H, 1]
    # w_out_ref:[D_out, H], b_out_ref:[D_out, 1]
    # o_ref:    [D_out, TILE_B]
    h = jnp.dot(w_in_ref[...], x_ref[...], preferred_element_type=jnp.float32)
    h = h + b_in_ref[...]
    h = _activation(h, activation)

    # Hidden layers: statically unrolled (L is small); biases read per layer,
    # broadcast along the lane (batch) axis only.
    for i in range(n_hidden_layers):
        h = jnp.dot(w_hid_ref[i], h, preferred_element_type=jnp.float32)
        h = h + b_hid_ref[i]
        h = _activation(h, activation)

    out = jnp.dot(w_out_ref[...], h, preferred_element_type=jnp.float32)
    out = out + b_out_ref[...]
    o_ref[...] = out.astype(o_ref.dtype)


def mlp_forward(x, params, *, n_hidden_layers, activation, tile_b=512):
    """Fused MLP forward. x: [B, D_in] float32 -> [B, D_out] float32.

    params (PyTorch [out, in] weight convention):
      w_in  [H, D_in],    b_in  [H, 1]
      w_hid [L, H, H],    b_hid [L, H, 1]   (L >= 1; dummy row if no hidden layers)
      w_out [D_out, H],   b_out [D_out, 1]
    """
    batch, d_in = x.shape
    d_out = params["w_out"].shape[0]
    hidden = params["w_in"].shape[0]
    n_stacked = params["w_hid"].shape[0]

    # Batch (lane) tiling: tile must be a multiple of 128; pad batch up to a
    # multiple of the tile.  Small batches collapse to a single 128-wide tile.
    tile_b = max(128, (tile_b // 128) * 128)
    b_min = pl.cdiv(batch, 128) * 128
    tile_b = min(tile_b, b_min)
    b_pad = pl.cdiv(batch, tile_b) * tile_b
    grid = (b_pad // tile_b,)

    # Transpose to batch-on-lanes layout and zero-pad the batch axis.
    x_t = jnp.zeros((d_in, b_pad), jnp.float32).at[:, :batch].set(x.T)

    kernel = functools.partial(
        _mlp_kernel, n_hidden_layers=n_hidden_layers, activation=activation)

    const2 = lambda i: (0, 0)
    const3 = lambda i: (0, 0, 0)

    out_t = pl.pallas_call(
        kernel,
        out_shape=jax.ShapeDtypeStruct((d_out, b_pad), jnp.float32),
        grid=grid,
        in_specs=[
            pl.BlockSpec((d_in, tile_b), lambda i: (0, i)),          # x tile
            pl.BlockSpec((hidden, d_in), const2),                     # w_in (resident)
            pl.BlockSpec((hidden, 1), const2),                        # b_in
            pl.BlockSpec((n_stacked, hidden, hidden), const3),        # w_hid
            pl.BlockSpec((n_stacked, hidden, 1), const3),             # b_hid
            pl.BlockSpec((d_out, hidden), const2),                    # w_out
            pl.BlockSpec((d_out, 1), const2),                         # b_out
        ],
        out_specs=pl.BlockSpec((d_out, tile_b), lambda i: (0, i)),
        compiler_params=pltpu.CompilerParams(
            dimension_semantics=("parallel",)),
    )(x_t, params["w_in"], params["b_in"], params["w_hid"], params["b_hid"],
      params["w_out"], params["b_out"])

    return out_t[:, :batch].T


def init_params(key, input_size, hidden_size, n_hidden_layers, output_size):
    """Deterministic init mimicking nn.Linear's U(-1/sqrt(fan_in), +) init.

    Weights kept in PyTorch's [out, in] convention (kernel computes W @ x^T);
    biases stored as [out, 1] for lane-broadcast inside the kernel.
    """
    keys = jax.random.split(key, 2 * (n_hidden_layers + 2))
    k = iter(keys)

    def linear(kw, kb, fan_in, fan_out):
        bound = 1.0 / jnp.sqrt(jnp.float32(fan_in))
        w = jax.random.uniform(kw, (fan_out, fan_in), jnp.float32, -bound, bound)
        b = jax.random.uniform(kb, (fan_out,), jnp.float32, -bound, bound)
        return w, b.reshape(fan_out, 1)

    w_in, b_in = linear(next(k), next(k), input_size, hidden_size)

    w_hid, b_hid = [], []
    for _ in range(n_hidden_layers):
        w, b = linear(next(k), next(k), hidden_size, hidden_size)
        w_hid.append(w)
        b_hid.append(b)

    if n_hidden_layers > 0:
        w_hid = jnp.stack(w_hid, axis=0)
        b_hid = jnp.stack(b_hid, axis=0)
    else:
        # Dummy (never read) so BlockSpec dims stay non-zero.
        w_hid = jnp.zeros((1, hidden_size, hidden_size), jnp.float32)
        b_hid = jnp.zeros((1, hidden_size, 1), jnp.float32)

    w_out, b_out = linear(next(k), next(k), hidden_size, output_size)

    return {"w_in": w_in, "b_in": b_in,
            "w_hid": w_hid, "b_hid": b_hid,
            "w_out": w_out, "b_out": b_out}


def reference_forward(x, params, *, n_hidden_layers, activation):
    """Pure-JAX reference mirroring PyTorch nn.Linear semantics."""
    h = x @ params["w_in"].T + params["b_in"][:, 0]
    h = _activation(h, activation)
    for i in range(n_hidden_layers):
        h = h @ params["w_hid"][i].T + params["b_hid"][i, :, 0]
        h = _activation(h, activation)
    return h @ params["w_out"].T + params["b_out"][:, 0]


if __name__ == "__main__":
    # Hyperparameters consistent with the module (PCA12 -> 12 inputs).
    hyper = {
        "input_size": 12,
        "hidden_size": 32,
        "n_hidden_layers": 3,
        "output_size": 16,
        "activation": "elu",
    }
    batch = 8

    key = jax.random.PRNGKey(0)
    k_params, k_x = jax.random.split(key)

    params = init_params(k_params, hyper["input_size"], hyper["hidden_size"],
                         hyper["n_hidden_layers"], hyper["output_size"])
    x = jax.random.normal(k_x, (batch, hyper["input_size"]), jnp.float32)

    out = mlp_forward(x, params,
                      n_hidden_layers=hyper["n_hidden_layers"],
                      activation=hyper["activation"])
    out = jax.block_until_ready(out)

    ref = reference_forward(x, params,
                            n_hidden_layers=hyper["n_hidden_layers"],
                            activation=hyper["activation"])
    assert out.shape == (batch, hyper["output_size"])
    assert jnp.allclose(out, ref, atol=1e-5, rtol=1e-5), "mismatch vs reference"

    print("KERNEL_OK")
</pallas_src>

<mosaic_0001>
module attributes {stable_mosaic.version = 11 : i64} {
  func.func @_mlp_kernel(%arg0: i32, %arg1: memref<12x128xf32, #tpu.memory_space<vmem>>, %arg2: memref<32x12xf32, #tpu.memory_space<vmem>>, %arg3: memref<32x1xf32, #tpu.memory_space<vmem>>, %arg4: memref<3x32x32xf32, #tpu.memory_space<vmem>>, %arg5: memref<3x32x1xf32, #tpu.memory_space<vmem>>, %arg6: memref<16x32xf32, #tpu.memory_space<vmem>>, %arg7: memref<16x1xf32, #tpu.memory_space<vmem>>, %arg8: memref<16x128xf32, #tpu.memory_space<vmem>>) attributes {dimension_semantics = [#tpu.dimension_semantics<parallel>], iteration_bounds = array<i64: 1>, scalar_prefetch = 0 : i64, scratch_operands = 0 : i64, tpu.core_type = #tpu.core_type<tc>, window_params = [{transform_indices = @transform_0, window_bounds = array<i64: 12, 128>}, {pipeline_mode = #tpu.pipeline_mode<synchronous>, transform_indices = @transform_1, window_bounds = array<i64: 32, 12>}, {pipeline_mode = #tpu.pipeline_mode<synchronous>, transform_indices = @transform_2, window_bounds = array<i64: 32, 1>}, {pipeline_mode = #tpu.pipeline_mode<synchronous>, transform_indices = @transform_3, window_bounds = array<i64: 3, 32, 32>}, {pipeline_mode = #tpu.pipeline_mode<synchronous>, transform_indices = @transform_4, window_bounds = array<i64: 3, 32, 1>}, {pipeline_mode = #tpu.pipeline_mode<synchronous>, transform_indices = @transform_5, window_bounds = array<i64: 16, 32>}, {pipeline_mode = #tpu.pipeline_mode<synchronous>, transform_indices = @transform_6, window_bounds = array<i64: 16, 1>}, {transform_indices = @transform_7, window_bounds = array<i64: 16, 128>}]} {
    %c0 = arith.constant 0 : index
    %c0_0 = arith.constant 0 : index
    %0 = vector.load %arg2[%c0, %c0_0] : memref<32x12xf32, #tpu.memory_space<vmem>>, vector<32x12xf32>
    %c0_1 = arith.constant 0 : index
    %c0_2 = arith.constant 0 : index
    %1 = vector.load %arg1[%c0_1, %c0_2] : memref<12x128xf32, #tpu.memory_space<vmem>>, vector<12x128xf32>
    %cst = arith.constant dense<0.000000e+00> : vector<32x128xf32>
    %2 = tpu.matmul %0, %1, %cst {dimension_numbers = #tpu.dot_dimension_numbers<[1], [0], [0], [1], [0, 0, 1, 1], [], []>} : vector<32x12xf32>, vector<12x128xf32>, vector<32x128xf32> -> vector<32x128xf32>
    %c0_3 = arith.constant 0 : index
    %c0_4 = arith.constant 0 : index
    %3 = vector.load %arg3[%c0_3, %c0_4] : memref<32x1xf32, #tpu.memory_space<vmem>>, vector<32x1xf32>
    %4 = vector.broadcast %3 : vector<32x1xf32> to vector<32x128xf32>
    %5 = arith.addf %2, %4 : vector<32x128xf32>
    %cst_5 = arith.constant 0.000000e+00 : f32
    %6 = vector.broadcast %cst_5 : f32 to vector<32x128xf32>
    %7 = arith.cmpf ogt, %5, %6 : vector<32x128xf32>
    %cst_6 = arith.constant 0.000000e+00 : f32
    %8 = vector.broadcast %cst_6 : f32 to vector<32x128xf32>
    %9 = arith.minimumf %5, %8 : vector<32x128xf32>
    %10 = math.exp %9 : vector<32x128xf32>
    %cst_7 = arith.constant 1.000000e+00 : f32
    %11 = vector.broadcast %cst_7 : f32 to vector<32x128xf32>
    %12 = arith.subf %10, %11 : vector<32x128xf32>
    %13 = arith.select %7, %5, %12 : vector<32x128xi1>, vector<32x128xf32>
    %c0_8 = arith.constant 0 : index
    %c0_9 = arith.constant 0 : index
    %c0_10 = arith.constant 0 : index
    %14 = vector.load %arg4[%c0_8, %c0_9, %c0_10] : memref<3x32x32xf32, #tpu.memory_space<vmem>>, vector<1x32x32xf32>
    %15 = vector.shape_cast %14 : vector<1x32x32xf32> to vector<32x32xf32>
    %cst_11 = arith.constant dense<0.000000e+00> : vector<32x128xf32>
    %16 = tpu.matmul %15, %13, %cst_11 {dimension_numbers = #tpu.dot_dimension_numbers<[1], [0], [0], [1], [0, 0, 1, 1], [], []>} : vector<32x32xf32>, vector<32x128xf32>, vector<32x128xf32> -> vector<32x128xf32>
    %c0_12 = arith.constant 0 : index
    %c0_13 = arith.constant 0 : index
    %c0_14 = arith.constant 0 : index
    %17 = vector.load %arg5[%c0_12, %c0_13, %c0_14] : memref<3x32x1xf32, #tpu.memory_space<vmem>>, vector<1x32x1xf32>
    %18 = vector.shape_cast %17 : vector<1x32x1xf32> to vector<32x1xf32>
    %19 = vector.broadcast %18 : vector<32x1xf32> to vector<32x128xf32>
    %20 = arith.addf %16, %19 : vector<32x128xf32>
    %cst_15 = arith.constant 0.000000e+00 : f32
    %21 = vector.broadcast %cst_15 : f32 to vector<32x128xf32>
    %22 = arith.cmpf ogt, %20, %21 : vector<32x128xf32>
    %cst_16 = arith.constant 0.000000e+00 : f32
    %23 = vector.broadcast %cst_16 : f32 to vector<32x128xf32>
    %24 = arith.minimumf %20, %23 : vector<32x128xf32>
    %25 = math.exp %24 : vector<32x128xf32>
    %cst_17 = arith.constant 1.000000e+00 : f32
    %26 = vector.broadcast %cst_17 : f32 to vector<32x128xf32>
    %27 = arith.subf %25, %26 : vector<32x128xf32>
    %28 = arith.select %22, %20, %27 : vector<32x128xi1>, vector<32x128xf32>
    %c1 = arith.constant 1 : index
    %c0_18 = arith.constant 0 : index
    %c0_19 = arith.constant 0 : index
    %29 = vector.load %arg4[%c1, %c0_18, %c0_19] : memref<3x32x32xf32, #tpu.memory_space<vmem>>, vector<1x32x32xf32>
    %30 = vector.shape_cast %29 : vector<1x32x32xf32> to vector<32x32xf32>
    %cst_20 = arith.constant dense<0.000000e+00> : vector<32x128xf32>
    %31 = tpu.matmul %30, %28, %cst_20 {dimension_numbers = #tpu.dot_dimension_numbers<[1], [0], [0], [1], [0, 0, 1, 1], [], []>} : vector<32x32xf32>, vector<32x128xf32>, vector<32x128xf32> -> vector<32x128xf32>
    %c1_21 = arith.constant 1 : index
    %c0_22 = arith.constant 0 : index
    %c0_23 = arith.constant 0 : index
    %32 = vector.load %arg5[%c1_21, %c0_22, %c0_23] : memref<3x32x1xf32, #tpu.memory_space<vmem>>, vector<1x32x1xf32>
    %33 = vector.shape_cast %32 : vector<1x32x1xf32> to vector<32x1xf32>
    %34 = vector.broadcast %33 : vector<32x1xf32> to vector<32x128xf32>
    %35 = arith.addf %31, %34 : vector<32x128xf32>
    %cst_24 = arith.constant 0.000000e+00 : f32
    %36 = vector.broadcast %cst_24 : f32 to vector<32x128xf32>
    %37 = arith.cmpf ogt, %35, %36 : vector<32x128xf32>
    %cst_25 = arith.constant 0.000000e+00 : f32
    %38 = vector.broadcast %cst_25 : f32 to vector<32x128xf32>
    %39 = arith.minimumf %35, %38 : vector<32x128xf32>
    %40 = math.exp %39 : vector<32x128xf32>
    %cst_26 = arith.constant 1.000000e+00 : f32
    %41 = vector.broadcast %cst_26 : f32 to vector<32x128xf32>
    %42 = arith.subf %40, %41 : vector<32x128xf32>
    %43 = arith.select %37, %35, %42 : vector<32x128xi1>, vector<32x128xf32>
    %c2 = arith.constant 2 : index
    %c0_27 = arith.constant 0 : index
    %c0_28 = arith.constant 0 : index
    %44 = vector.load %arg4[%c2, %c0_27, %c0_28] : memref<3x32x32xf32, #tpu.memory_space<vmem>>, vector<1x32x32xf32>
    %45 = vector.shape_cast %44 : vector<1x32x32xf32> to vector<32x32xf32>
    %cst_29 = arith.constant dense<0.000000e+00> : vector<32x128xf32>
    %46 = tpu.matmul %45, %43, %cst_29 {dimension_numbers = #tpu.dot_dimension_numbers<[1], [0], [0], [1], [0, 0, 1, 1], [], []>} : vector<32x32xf32>, vector<32x128xf32>, vector<32x128xf32> -> vector<32x128xf32>
    %c2_30 = arith.constant 2 : index
    %c0_31 = arith.constant 0 : index
    %c0_32 = arith.constant 0 : index
    %47 = vector.load %arg5[%c2_30, %c0_31, %c0_32] : memref<3x32x1xf32, #tpu.memory_space<vmem>>, vector<1x32x1xf32>
    %48 = vector.shape_cast %47 : vector<1x32x1xf32> to vector<32x1xf32>
    %49 = vector.broadcast %48 : vector<32x1xf32> to vector<32x128xf32>
    %50 = arith.addf %46, %49 : vector<32x128xf32>
    %cst_33 = arith.constant 0.000000e+00 : f32
    %51 = vector.broadcast %cst_33 : f32 to vector<32x128xf32>
    %52 = arith.cmpf ogt, %50, %51 : vector<32x128xf32>
    %cst_34 = arith.constant 0.000000e+00 : f32
    %53 = vector.broadcast %cst_34 : f32 to vector<32x128xf32>
    %54 = arith.minimumf %50, %53 : vector<32x128xf32>
    %55 = math.exp %54 : vector<32x128xf32>
    %cst_35 = arith.constant 1.000000e+00 : f32
    %56 = vector.broadcast %cst_35 : f32 to vector<32x128xf32>
    %57 = arith.subf %55, %56 : vector<32x128xf32>
    %58 = arith.select %52, %50, %57 : vector<32x128xi1>, vector<32x128xf32>
    %c0_36 = arith.constant 0 : index
    %c0_37 = arith.constant 0 : index
    %59 = vector.load %arg6[%c0_36, %c0_37] : memref<16x32xf32, #tpu.memory_space<vmem>>, vector<16x32xf32>
    %cst_38 = arith.constant dense<0.000000e+00> : vector<16x128xf32>
    %60 = tpu.matmul %59, %58, %cst_38 {dimension_numbers = #tpu.dot_dimension_numbers<[1], [0], [0], [1], [0, 0, 1, 1], [], []>} : vector<16x32xf32>, vector<32x128xf32>, vector<16x128xf32> -> vector<16x128xf32>
    %c0_39 = arith.constant 0 : index
    %c0_40 = arith.constant 0 : index
    %61 = vector.load %arg7[%c0_39, %c0_40] : memref<16x1xf32, #tpu.memory_space<vmem>>, vector<16x1xf32>
    %62 = vector.broadcast %61 : vector<16x1xf32> to vector<16x128xf32>
    %63 = arith.addf %60, %62 : vector<16x128xf32>
    %c0_41 = arith.constant 0 : index
    %c0_42 = arith.constant 0 : index
    %64 = vector.load %arg8[%c0_41, %c0_42] : memref<16x128xf32, #tpu.memory_space<vmem>>, vector<16x128xf32>
    tpu.vector_store %arg8[%c0_41, %c0_42], %63 {strides = array<i32>} : memref<16x128xf32, #tpu.memory_space<vmem>>, vector<16x128xf32>,
    return
  }
  func.func @transform_0(%arg0: i32) -> (i32, i32) {
    %c0_i32 = arith.constant 0 : i32
    %c0_i32_0 = arith.constant 0 : i32
    return %c0_i32, %arg0 : i32, i32
  }
  func.func @transform_1(%arg0: i32) -> (i32, i32) {
    %c0_i32 = arith.constant 0 : i32
    %c0_i32_0 = arith.constant 0 : i32
    %c0_i32_1 = arith.constant 0 : i32
    return %c0_i32, %c0_i32_0 : i32, i32
  }
  func.func @transform_2(%arg0: i32) -> (i32, i32) {
    %c0_i32 = arith.constant 0 : i32
    %c0_i32_0 = arith.constant 0 : i32
    %c0_i32_1 = arith.constant 0 : i32
    return %c0_i32, %c0_i32_0 : i32, i32
  }
  func.func @transform_3(%arg0: i32) -> (i32, i32, i32) {
    %c0_i32 = arith.constant 0 : i32
    %c0_i32_0 = arith.constant 0 : i32
    %c0_i32_1 = arith.constant 0 : i32
    %c0_i32_2 = arith.constant 0 : i32
    return %c0_i32, %c0_i32_0, %c0_i32_1 : i32, i32, i32
  }
  func.func @transform_4(%arg0: i32) -> (i32, i32, i32) {
    %c0_i32 = arith.constant 0 : i32
    %c0_i32_0 = arith.constant 0 : i32
    %c0_i32_1 = arith.constant 0 : i32
    %c0_i32_2 = arith.constant 0 : i32
    return %c0_i32, %c0_i32_0, %c0_i32_1 : i32, i32, i32
  }
  func.func @transform_5(%arg0: i32) -> (i32, i32) {
    %c0_i32 = arith.constant 0 : i32
    %c0_i32_0 = arith.constant 0 : i32
    %c0_i32_1 = arith.constant 0 : i32
    return %c0_i32, %c0_i32_0 : i32, i32
  }
  func.func @transform_6(%arg0: i32) -> (i32, i32) {
    %c0_i32 = arith.constant 0 : i32
    %c0_i32_0 = arith.constant 0 : i32
    %c0_i32_1 = arith.constant 0 : i32
    return %c0_i32, %c0_i32_0 : i32, i32
  }
  func.func @transform_7(%arg0: i32) -> (i32, i32) {
    %c0_i32 = arith.constant 0 : i32
    %c0_i32_0 = arith.constant 0 : i32
    return %c0_i32, %arg0 : i32, i32
  }
}

</mosaic_0001>

<bundles_post_ra>
// kernel: tpu_custom_call.1
= control target key start
LH: loop header
LB: loop body
LE: loop exit
PB: predicated region body
PF: predicated region fallthrough
CT: control target
= control target key end

     0   :  { %vm70_vm0 = vcmask 1043456   ;;  %v592_v3 = vmov 0   ;;  %vm57_vm1 = vcmask 97280   ;;  %s771_s0 = inlined_call_operand.vmem [shape: f32[12,128], index: 0, kind: input, shape index: {}]   ;;  %s772_s1 = inlined_call_operand.vmem [shape: f32[32,12], index: 1, kind: input, shape index: {}]   ;;  %s773_s2 = inlined_call_operand.vmem [shape: f32[32,1], index: 2, kind: input, shape index: {}]   ;;  %s774_s3 = inlined_call_operand.vmem [shape: f32[3,32,32], index: 3, kind: input, shape index: {}]   ;;  %s775_s4 = inlined_call_operand.vmem [shape: f32[3,32,1], index: 4, kind: input, shape index: {}]   ;;  %s776_s5 = inlined_call_operand.vmem [shape: f32[16,32], index: 5, kind: input, shape index: {}]   ;;  %s777_s6 = inlined_call_operand.vmem [shape: f32[16,1], index: 6, kind: input, shape index: {}]   ;;  %s778_s7 = inlined_call_operand.hbm [shape: f32[16,128], index: 7, kind: output, shape index: {}]  }
   0x1   :  { %v32_v0 = vld [vmem:[%s771_s0 + $0x8] sm:$0xf]  ;;  %v36_v1 = vld [vmem:[%s773_s2 + $0x18] sm:$0xff]  ;;  %532 = vset.pattern.permute.xlu1 %v592_v3  ;;  %531 = vset.pattern.permute.xlu0 %v592_v3  ;;  %v31_v4 = vld [vmem:[%s771_s0] sm:$0xff] }
   0x2   :  { %v34_v2 = vld [vmem:[%s773_s2 + $0x8] sm:$0xff]  ;;  %474 = vmatpush.msk.msra.mxu0 %vm70_vm0, %v32_v0  ;;  %525 = vmatpush.msk.msra.mxu1 %vm70_vm0, %v32_v0  ;;  %v27_v5 = vld [vmem:[%s772_s1] sm:$0xff]  ;;  %v30_v6 = vld [vmem:[%s772_s1 + $0x18] sm:$0xff] }
   0x3   :  { %54 = vperm.xlu0 %531, %v36_v1   ;;  %44 = vperm.xlu1 %532, %v34_v2  }
   0x4   :  { %89 = vmatpush.msra.mxu0 %v31_v4  ;;  %526 = vmatpush.msra.mxu1 %v31_v4 }
   0x5   :  { %475 = vmatmul.msk.f32.vlgmr.msra.gmra.mxu0 %vm57_vm1, %v27_v5  ;;  %478 = vmatmul.msk.f32.vlgmr.msra.gmra.mxu1 %vm57_vm1, %v30_v6 }
   0x6   :  { %12 = vsyncpa [#allocation3], 0  ;;  %533 = vset.pattern.permute.xlu2 %v592_v3  ;;  %v35_v7 = vld [vmem:[%s773_s2 + $0x10] sm:$0xff]  ;;  %v33_v8 = vld [vmem:[%s773_s2] sm:$0xff]  ;;  %vm155_vm6 = vcmask 261120   ;;  %s593_s21 = smov [#allocation2]  }
   0x7   :  { %v28_v9 = vld [vmem:[%s772_s1 + $0x8] sm:$0xff]  ;;  %v131_v11 = vld [vmem:[%s775_s4] sm:$0xff]  ;;  %v29_v12 = vld [vmem:[%s772_s1 + $0x10] sm:$0xff]  ;;  %s460_s22 = sshll.u32 %s593_s21, 4  ;;  %s462_s24 = sshll.u32 %s778_s7, 4  ;;  %s461_s22 = int_to_ptr.vmem [resolvable:$true] %s460_s22  ;;  %s463_s24 = int_to_ptr.hbm [resolvable:$true] %s462_s24 }
   0x8   :  { %v132_v10 = vld [vmem:[%s775_s4 + $0x8] sm:$0xff]  ;;  %v497_v13 = vld [vmem:[%s775_s4 + $0x30] sm:$0xff]  ;;  %v514_v15 = vld [vmem:[%s775_s4 + $0x58] sm:$0xff]  ;;  %s594_s25 = smov 128  }
   0x9   :  { %v496_v14 = vld [vmem:[%s775_s4 + $0x28] sm:$0xff]  ;;  %v513_v16 = vld [vmem:[%s775_s4 + $0x50] sm:$0xff]  ;;  %v511_v17 = vld [vmem:[%s775_s4 + $0x40] sm:$0xff] }
   0xa   :  { %v413_v18 = vld [vmem:[%s777_s6] sm:$0xff]  ;;  %v134_v33 = vld [vmem:[%s775_s4 + $0x18] sm:$0xff]  ;;  %v133_v43 = vld [vmem:[%s775_s4 + $0x10] sm:$0xff] }
   0xb   :  { %49 = vperm.xlu0 %531, %v35_v7   ;;  %39 = vperm.xlu1 %532, %v33_v8   ;;  %v498_v49 = vld [vmem:[%s775_s4 + $0x38] sm:$0xff]  ;;  %v127_v53 = vld [vmem:[%s774_s3] sm:$0xff]  ;;  %v128_v56 = vld [vmem:[%s774_s3 + $0x8] sm:$0xff] }
   0xc   :  { %152 = vperm.xlu2 %533, %v134_v33   ;;  %v495_v55 = vld [vmem:[%s775_s4 + $0x20] sm:$0xff]  ;;  %v512_v57 = vld [vmem:[%s775_s4 + $0x48] sm:$0xff]  ;;  %v129_v58 = vld [vmem:[%s774_s3 + $0x10] sm:$0xff] }
   0xd   :  { %476 = vmatmul.msk.f32.gmra.mxu0 %vm57_vm1, %v28_v9  ;;  %v414_v59 = vld [vmem:[%s777_s6 + $0x8] sm:$0xff]  ;;  %v130_v60 = vld [vmem:[%s774_s3 + $0x18] sm:$0xff] }
  0x13   :  { %142 = vperm.xlu0 %531, %v132_v10   ;;  %137 = vperm.xlu1 %532, %v131_v11  }
  0x14   :  { %147 = vperm.xlu2 %533, %v133_v43  }
  0x15   :  { %477 = vmatmul.msk.f32.gmra.mxu0 %vm57_vm1, %v29_v12 }
  0x1b   :  { %243 = vperm.xlu0 %531, %v497_v13   ;;  %238 = vperm.xlu1 %532, %v496_v14  }
  0x1c   :  { %248 = vperm.xlu2 %533, %v498_v49  }
  0x23   :  { %343 = vperm.xlu0 %531, %v514_v15   ;;  %338 = vperm.xlu1 %532, %v513_v16  }
  0x24   :  { %233 = vperm.xlu2 %533, %v495_v55  }
  0x2b   :  { %328 = vperm.xlu0 %531, %v511_v17   ;;  %417 = vperm.xlu1 %532, %v413_v18  }
  0x2c   :  { %333 = vperm.xlu2 %533, %v512_v57  }
  0x34   :  { %422 = vperm.xlu2 %533, %v414_v59  }
  0x66   :  { %v153_v62 = vpop.permute.xlu2 %152 }
  0x6e   :  { %v148_v0 = vpop.permute.xlu2 %147 }
  0x75   :  { %v55_v19 = vpop.permute.xlu0 %54  ;;  %v45_v20 = vpop.permute.xlu1 %44 }
  0x7d   :  { %v40_v27 = vpop.permute.xlu1 %39  ;;  %v50_v35 = vpop.permute.xlu0 %49 }
  0x82   :  { %v91_v21 = vpop.f32.mrf.mxu0  ;;  %v100_v22 = vpop.f32.mrf.mxu1 }
  0x83   :  { %v101_v23 = vadd.f32 %v100_v22, %v55_v19  ;;  %v92_v29 = vadd.f32 %v91_v21, %v40_v27 }
  0x85   :  { %v110_v24 = vmin.f32 %v101_v23, 0.0  ;;  %v107_v32 = vmin.f32 %v92_v29, 0.0  ;;  %vm106_vm2 = vcmp.gt.f32.partialorder %v101_v23, 0.0  ;;  %vm103_vm5 = vcmp.gt.f32.partialorder %v92_v29, 0.0  ;;  %v143_v2 = vpop.permute.xlu0 %142  ;;  %v138_v5 = vpop.permute.xlu1 %137 }
  0x87   :  { %v117_v25 = vmul.f32 1.442695, %v110_v24  ;;  %v111_v40 = vmul.f32 1.442695, %v107_v32  ;;  %v494_v32 = vld [vmem:[%s774_s3 + $0x38] sm:$0xff] }
  0x89   :  { %534 = vpow2.f32 %v117_v25 }
  0x8a   :  { %v94_v26 = vpop.f32.mrf.mxu0 }
  0x8b   :  { %v95_v28 = vadd.f32 %v94_v26, %v45_v20 }
  0x8d   :  { %v108_v30 = vmin.f32 %v95_v28, 0.0  ;;  %vm104_vm4 = vcmp.gt.f32.partialorder %v95_v28, 0.0 }
  0x8f   :  { %v535_v31 = vpop.eup %534  ;;  %v113_v37 = vmul.f32 1.442695, %v108_v30  ;;  %v492_v30 = vld [vmem:[%s774_s3 + $0x28] sm:$0xff] }
  0x90   :  { %v482_v34 = vadd.f32 -1.0, %v535_v31  ;;  %v493_v31 = vld [vmem:[%s774_s3 + $0x30] sm:$0xff] }
  0x91   :  { %536 = vpow2.f32 %v113_v37 }
  0x92   :  { %v97_v36 = vpop.f32.mrf.mxu0  ;;  %v126_v39 = vsel %vm106_vm2, %v101_v23, %v482_v34  ;;  %538 = vpow2.f32 %v111_v40 }
  0x93   :  { %v98_v38 = vadd.f32 %v97_v36, %v50_v35  ;;  %180 = vmatpush.msrb.mxu1 %v126_v39  ;;  %v249_v35 = vpop.permute.xlu2 %248  ;;  %v244_v36 = vpop.permute.xlu0 %243 }
  0x95   :  { %v109_v41 = vmin.f32 %v98_v38, 0.0  ;;  %vm105_vm3 = vcmp.gt.f32.partialorder %v98_v38, 0.0 }
  0x97   :  { %v115_v42 = vmul.f32 1.442695, %v109_v41  ;;  %v537_v44 = vpop.eup %536 }
  0x98   :  { %v539_v45 = vpop.eup %538  ;;  %v480_v48 = vadd.f32 -1.0, %v537_v44 }
  0x99   :  { %540 = vpow2.f32 %v115_v42  ;;  %v479_v51 = vadd.f32 -1.0, %v539_v45 }
  0x9a   :  { %v124_v52 = vsel %vm104_vm4, %v95_v28, %v480_v48  ;;  %v491_v28 = vld [vmem:[%s774_s3 + $0x20] sm:$0xff] }
  0x9b   :  { %v123_v54 = vsel %vm103_vm5, %v92_v29, %v479_v51  ;;  %v234_v41 = vpop.permute.xlu2 %233 }
  0x9f   :  { %v541_v46 = vpop.eup %540 }
  0xa0   :  { %v481_v47 = vadd.f32 -1.0, %v541_v46 }
  0xa2   :  { %v125_v50 = vsel %vm105_vm3, %v98_v38, %v481_v47  ;;  %v239_v38 = vpop.permute.xlu1 %238 }
  0xa3   :  { %181 = vmatpush.msrb.mxu1 %v125_v50 }
  0xa5   :  { %182 = vmatpush.msrb.mxu1 %v124_v52 }
  0xa7   :  { %183 = vmatpush.msrb.mxu1 %v123_v54 }
  0xa8   :  { %483 = vmatmul.msk.f32.vlgmr.msrb.gmra.mxu1 %vm155_vm6, %v127_v53 }
  0xb0   :  { %484 = vmatmul.msk.f32.gmra.mxu1 %vm155_vm6, %v128_v56 }
  0xb8   :  { %485 = vmatmul.msk.f32.gmra.mxu1 %vm155_vm6, %v129_v58 }
  0xc0   :  { %486 = vmatmul.msk.f32.gmra.mxu1 %vm155_vm6, %v130_v60 }
 0x125   :  { %v185_v61 = vpop.f32.mrf.mxu1 }
 0x126   :  { %v186_v6 = vadd.f32 %v185_v61, %v138_v5 }
 0x128   :  { %v201_v10 = vmin.f32 %v186_v6, 0.0  ;;  %vm197_vm10 = vcmp.gt.f32.partialorder %v186_v6, 0.0 }
 0x12a   :  { %v205_v15 = vmul.f32 1.442695, %v201_v10  ;;  %v334_v10 = vpop.permute.xlu2 %333 }
 0x12d   :  { %v188_v63 = vpop.f32.mrf.mxu1 }
 0x12e   :  { %v189_v4 = vadd.f32 %v188_v63, %v143_v2  ;;  %v508_v2 = vld [vmem:[%s774_s3 + $0x48] sm:$0xff] }
 0x130   :  { %v202_v8 = vmin.f32 %v189_v4, 0.0  ;;  %vm198_vm9 = vcmp.gt.f32.partialorder %v189_v4, 0.0 }
 0x132   :  { %v207_v13 = vmul.f32 1.442695, %v202_v8  ;;  %v339_v8 = vpop.permute.xlu1 %338 }
 0x135   :  { %v191_v1 = vpop.f32.mrf.mxu1 }
 0x136   :  { %v192_v3 = vadd.f32 %v191_v1, %v148_v0  ;;  %v507_v0 = vld [vmem:[%s774_s3 + $0x40] sm:$0xff] }
 0x138   :  { %v203_v7 = vmin.f32 %v192_v3, 0.0  ;;  %vm199_vm8 = vcmp.gt.f32.partialorder %v192_v3, 0.0 }
 0x13a   :  { %v209_v11 = vmul.f32 1.442695, %v203_v7  ;;  %v344_v7 = vpop.permute.xlu0 %343 }
 0x13c   :  { %542 = vpow2.f32 %v209_v11 }
 0x13d   :  { %v194_v9 = vpop.f32.mrf.mxu1  ;;  %544 = vpow2.f32 %v207_v13 }
 0x13e   :  { %v195_v12 = vadd.f32 %v194_v9, %v153_v62 }
 0x140   :  { %v204_v14 = vmin.f32 %v195_v12, 0.0  ;;  %vm200_vm7 = vcmp.gt.f32.partialorder %v195_v12, 0.0 }
 0x142   :  { %v211_v16 = vmul.f32 1.442695, %v204_v14  ;;  %v543_v17 = vpop.eup %542  ;;  %v329_v13 = vpop.permute.xlu0 %328 }
 0x143   :  { %v545_v18 = vpop.eup %544  ;;  %v489_v21 = vadd.f32 -1.0, %v543_v17 }
 0x144   :  { %546 = vpow2.f32 %v211_v16  ;;  %v488_v24 = vadd.f32 -1.0, %v545_v18 }
 0x145   :  { %548 = vpow2.f32 %v205_v15  ;;  %v219_v25 = vsel %vm199_vm8, %v192_v3, %v489_v21  ;;  %v509_v3 = vld [vmem:[%s774_s3 + $0x50] sm:$0xff] }
 0x146   :  { %v218_v27 = vsel %vm198_vm9, %v189_v4, %v488_v24  ;;  %v510_v4 = vld [vmem:[%s774_s3 + $0x58] sm:$0xff] }
 0x14a   :  { %v547_v19 = vpop.eup %546 }
 0x14b   :  { %v490_v20 = vadd.f32 -1.0, %v547_v19  ;;  %v549_v22 = vpop.eup %548 }
 0x14c   :  { %v487_v26 = vadd.f32 -1.0, %v549_v22 }
 0x14d   :  { %v220_v23 = vsel %vm200_vm7, %v195_v12, %v490_v20 }
 0x14e   :  { %275 = vmatpush.msra.mxu2 %v220_v23  ;;  %v217_v29 = vsel %vm197_vm10, %v186_v6, %v487_v26 }
 0x150   :  { %276 = vmatpush.msra.mxu2 %v219_v25 }
 0x152   :  { %277 = vmatpush.msra.mxu2 %v218_v27 }
 0x154   :  { %278 = vmatpush.msra.mxu2 %v217_v29 }
 0x155   :  { %499 = vmatmul.msk.f32.vlgmr.msra.gmra.mxu2 %vm155_vm6, %v491_v28 }
 0x15d   :  { %500 = vmatmul.msk.f32.gmra.mxu2 %vm155_vm6, %v492_v30 }
 0x165   :  { %501 = vmatmul.msk.f32.gmra.mxu2 %vm155_vm6, %v493_v31 }
 0x16d   :  { %502 = vmatmul.msk.f32.gmra.mxu2 %vm155_vm6, %v494_v32 }
 0x1d8   :  { %v280_v33 = vpop.f32.mrf.mxu2 }
 0x1d9   :  { %v281_v42 = vadd.f32 %v280_v33, %v234_v41 }
 0x1db   :  { %v296_v46 = vmin.f32 %v281_v42, 0.0  ;;  %vm292_vm14 = vcmp.gt.f32.partialorder %v281_v42, 0.0 }
 0x1dd   :  { %v300_v51 = vmul.f32 1.442695, %v296_v46 }
 0x1e0   :  { %v283_v34 = vpop.f32.mrf.mxu2 }
 0x1e1   :  { %v284_v40 = vadd.f32 %v283_v34, %v239_v38  ;;  %v412_v38 = vld [vmem:[%s776_s5 + $0x8] sm:$0xff] }
 0x1e3   :  { %v297_v44 = vmin.f32 %v284_v40, 0.0  ;;  %vm293_vm13 = vcmp.gt.f32.partialorder %v284_v40, 0.0 }
 0x1e5   :  { %v302_v49 = vmul.f32 1.442695, %v297_v44 }
 0x1e8   :  { %v286_v37 = vpop.f32.mrf.mxu2 }
 0x1e9   :  { %v287_v39 = vadd.f32 %v286_v37, %v244_v36  ;;  %v411_v36 = vld [vmem:[%s776_s5] sm:$0xff]  ;;  %s595_s5 = smov 8  }
 0x1eb   :  { %v298_v43 = vmin.f32 %v287_v39, 0.0  ;;  %vm294_vm12 = vcmp.gt.f32.partialorder %v287_v39, 0.0 }
 0x1ed   :  { %v304_v47 = vmul.f32 1.442695, %v298_v43 }
 0x1ef   :  { %550 = vpow2.f32 %v304_v47 }
 0x1f0   :  { %v289_v45 = vpop.f32.mrf.mxu2  ;;  %552 = vpow2.f32 %v302_v49 }
 0x1f1   :  { %v290_v48 = vadd.f32 %v289_v45, %v249_v35 }
 0x1f3   :  { %v299_v50 = vmin.f32 %v290_v48, 0.0  ;;  %vm295_vm11 = vcmp.gt.f32.partialorder %v290_v48, 0.0 }
 0x1f5   :  { %v306_v52 = vmul.f32 1.442695, %v299_v50  ;;  %v551_v53 = vpop.eup %550 }
 0x1f6   :  { %v553_v54 = vpop.eup %552  ;;  %v505_v57 = vadd.f32 -1.0, %v551_v53 }
 0x1f7   :  { %554 = vpow2.f32 %v306_v52  ;;  %v504_v60 = vadd.f32 -1.0, %v553_v54 }
 0x1f8   :  { %556 = vpow2.f32 %v300_v51  ;;  %v314_v61 = vsel %vm294_vm12, %v287_v39, %v505_v57  ;;  %v418_v39 = vpop.permute.xlu1 %417 }
 0x1f9   :  { %v313_v63 = vsel %vm293_vm13, %v284_v40, %v504_v60 }
 0x1fd   :  { %v555_v55 = vpop.eup %554 }
 0x1fe   :  { %v506_v56 = vadd.f32 -1.0, %v555_v55  ;;  %v557_v58 = vpop.eup %556 }
 0x1ff   :  { %v503_v62 = vadd.f32 -1.0, %v557_v58 }
 0x200   :  { %v315_v59 = vsel %vm295_vm11, %v290_v48, %v506_v56 }
 0x201   :  { %370 = vmatpush.msra.mxu3 %v315_v59  ;;  %v312_v1 = vsel %vm292_vm14, %v281_v42, %v503_v62  ;;  %v423_v42 = vpop.permute.xlu2 %422 }
 0x203   :  { %371 = vmatpush.msra.mxu3 %v314_v61 }
 0x205   :  { %372 = vmatpush.msra.mxu3 %v313_v63 }
 0x207   :  { %373 = vmatpush.msra.mxu3 %v312_v1 }
 0x208   :  { %515 = vmatmul.msk.f32.vlgmr.msra.gmra.mxu3 %vm155_vm6, %v507_v0 }
 0x210   :  { %516 = vmatmul.msk.f32.gmra.mxu3 %vm155_vm6, %v508_v2 }
 0x218   :  { %517 = vmatmul.msk.f32.gmra.mxu3 %vm155_vm6, %v509_v3 }
 0x220   :  { %518 = vmatmul.msk.f32.gmra.mxu3 %vm155_vm6, %v510_v4 }
 0x28b   :  { %v375_v5 = vpop.f32.mrf.mxu3 }
 0x28c   :  { %v376_v14 = vadd.f32 %v375_v5, %v329_v13 }
 0x28e   :  { %v391_v18 = vmin.f32 %v376_v14, 0.0  ;;  %vm387_vm2 = vcmp.gt.f32.partialorder %v376_v14, 0.0 }
 0x290   :  { %v395_v23 = vmul.f32 1.442695, %v391_v18 }
 0x293   :  { %v378_v6 = vpop.f32.mrf.mxu3 }
 0x294   :  { %v379_v12 = vadd.f32 %v378_v6, %v334_v10 }
 0x296   :  { %v392_v16 = vmin.f32 %v379_v12, 0.0  ;;  %vm388_vm1 = vcmp.gt.f32.partialorder %v379_v12, 0.0 }
 0x298   :  { %v397_v21 = vmul.f32 1.442695, %v392_v16 }
 0x29b   :  { %v381_v9 = vpop.f32.mrf.mxu3 }
 0x29c   :  { %v382_v11 = vadd.f32 %v381_v9, %v339_v8 }
 0x29e   :  { %v393_v15 = vmin.f32 %v382_v11, 0.0  ;;  %vm389_vm0 = vcmp.gt.f32.partialorder %v382_v11, 0.0 }
 0x2a0   :  { %v399_v19 = vmul.f32 1.442695, %v393_v15 }
 0x2a2   :  { %558 = vpow2.f32 %v399_v19 }
 0x2a3   :  { %v384_v17 = vpop.f32.mrf.mxu3  ;;  %560 = vpow2.f32 %v397_v21 }
 0x2a4   :  { %v385_v20 = vadd.f32 %v384_v17, %v344_v7 }
 0x2a6   :  { %v394_v22 = vmin.f32 %v385_v20, 0.0  ;;  %vm390_vm15 = vcmp.gt.f32.partialorder %v385_v20, 0.0 }
 0x2a8   :  { %v401_v24 = vmul.f32 1.442695, %v394_v22  ;;  %v559_v25 = vpop.eup %558 }
 0x2a9   :  { %v561_v26 = vpop.eup %560  ;;  %v521_v29 = vadd.f32 -1.0, %v559_v25 }
 0x2aa   :  { %562 = vpow2.f32 %v401_v24  ;;  %v520_v32 = vadd.f32 -1.0, %v561_v26 }
 0x2ab   :  { %564 = vpow2.f32 %v395_v23  ;;  %v409_v33 = vsel %vm389_vm0, %v382_v11, %v521_v29 }
 0x2ac   :  { %v408_v35 = vsel %vm388_vm1, %v379_v12, %v520_v32 }
 0x2b0   :  { %v563_v27 = vpop.eup %562 }
 0x2b1   :  { %v522_v28 = vadd.f32 -1.0, %v563_v27  ;;  %v565_v30 = vpop.eup %564 }
 0x2b2   :  { %v519_v34 = vadd.f32 -1.0, %v565_v30 }
 0x2b3   :  { %v410_v31 = vsel %vm390_vm15, %v385_v20, %v522_v28 }
 0x2b4   :  { %443 = vmatpush.msrb.mxu0 %v410_v31  ;;  %v407_v37 = vsel %vm387_vm2, %v376_v14, %v519_v34 }
 0x2b6   :  { %444 = vmatpush.msrb.mxu0 %v409_v33 }
 0x2b8   :  { %445 = vmatpush.msrb.mxu0 %v408_v35 }
 0x2ba   :  { %446 = vmatpush.msrb.mxu0 %v407_v37 }
 0x2bb   :  { %523 = vmatmul.msk.f32.vlgmr.msrb.gmra.mxu0 %vm155_vm6, %v411_v36 }
 0x2c3   :  { %524 = vmatmul.msk.f32.gmra.mxu0 %vm155_vm6, %v412_v38 }
 0x338   :  { %v448_v40 = vpop.f32.mrf.mxu0 }
 0x339   :  { %v449_v41 = vadd.f32 %v448_v40, %v418_v39 }
 0x33b   :  { %454 = vst [vmem:[#allocation2] sm:$0xff] %v449_v41 }
 0x340   :  { %v451_v43 = vpop.f32.mrf.mxu0 }
 0x341   :  { %v452_v44 = vadd.f32 %v451_v43, %v423_v42 }
 0x343   :  { %455 = vst [vmem:[#allocation2 + $0x8] sm:$0xff] %v452_v44 }
 0x344   :  { %468 = dma.vmem_to_hbm [thread:$0]  %s461_s22, 256, %s463_s24, [#allocation3], %s594_s25, %s594_s25, %s595_s5  }
 0x345   :  { %590 = dma.done.wait [#allocation3], 256  }
 0x346   :  { %591 = vsyncadd [#allocation3], 4294967040 }
 0x347   :  { %473 = vsyncpa [#allocation3], 1 }

</bundles_post_ra>
